<compile_context>
chip_gen: v7x
topology: tpu7x:2x2x1
jax: 0.10.0
libtpu: 0.0.40
codegen_flags: <defaults>
</compile_context>

<pallas_src>
from functools import partial

import jax
import jax.numpy as jnp
from jax.experimental import pallas as pl
from jax.experimental.pallas import tpu as pltpu

INPUT_DIM = 14
HIDDEN1 = 128
HIDDEN2 = 64
OUTPUT_DIM = 4
PAD_OUT = 8        # layer-3 width padded to 8 lanes (was 128): writeback ~16x smaller
MAX_TB = 512       # batch tile: amortizes per-grid-step overhead
MIN_SPLIT_TB = 128 # when splitting for a >=2-step grid, don't go below this


def dqn_kernel(x_ref, w1_ref, b1_ref, w2_ref, b2_ref, w3_ref, b3_ref, o_ref):
    # All-f32 matmuls on the MXU (kernel is HBM/overhead bound, not MXU bound),
    # f32 bias-add + ReLU on the VPU. K=14 on layer 1 is an architecture floor.
    h1 = jnp.maximum(
        jnp.dot(x_ref[...], w1_ref[...], preferred_element_type=jnp.float32)
        + b1_ref[...], 0.0)
    h2 = jnp.maximum(
        jnp.dot(h1, w2_ref[...], preferred_element_type=jnp.float32)
        + b2_ref[...], 0.0)
    out = jnp.dot(h2, w3_ref[...], preferred_element_type=jnp.float32) + b3_ref[...]
    o_ref[...] = out.astype(o_ref.dtype)


def _round_up(n, m):
    return ((n + m - 1) // m) * m


def _next_pow2(n):
    return 1 << max(0, (int(n) - 1)).bit_length()


def _bucket_batch(b):
    """Pad the batch to a power of two (>=16) so compiles are shared across B."""
    return max(16, _next_pow2(b))


def _choose_tile(b_pad):
    """Tile <= MAX_TB; keep >=2 grid steps for big batches (v7x: 2 TensorCores)."""
    tb = min(MAX_TB, b_pad)
    if b_pad >= 2 * MIN_SPLIT_TB and b_pad // tb < 2:
        tb = max(MIN_SPLIT_TB, b_pad // 2)
    return tb


def init_params(key):
    """Deterministic init, mimicking nn.Linear's uniform(-1/sqrt(fan_in), +)."""
    ks = jax.random.split(key, 6)

    def linear_init(kw, kb, fan_in, fan_out):
        bound = 1.0 / jnp.sqrt(jnp.float32(fan_in))
        # stored as (in, out) so the kernel does x @ W  (== x @ W_pt.T in PyTorch)
        w = jax.random.uniform(kw, (fan_in, fan_out), jnp.float32, -bound, bound)
        b = jax.random.uniform(kb, (1, fan_out), jnp.float32, -bound, bound)
        return w, b

    w1, b1 = linear_init(ks[0], ks[1], INPUT_DIM, HIDDEN1)
    w2, b2 = linear_init(ks[2], ks[3], HIDDEN1, HIDDEN2)
    w3, b3 = linear_init(ks[4], ks[5], HIDDEN2, OUTPUT_DIM)
    return (w1, b1, w2, b2, w3, b3)


def prepare_params(params):
    """One-time prep: zero-pad layer-3 weight/bias to PAD_OUT lanes (f32 kept)."""
    w1, b1, w2, b2, w3, b3 = params
    w3p = jnp.zeros((HIDDEN2, PAD_OUT), jnp.float32).at[:, :OUTPUT_DIM].set(w3)
    b3p = jnp.zeros((1, PAD_OUT), jnp.float32).at[:, :OUTPUT_DIM].set(b3)
    return (w1, b1, w2, b2, w3p, b3p)


@partial(jax.jit, static_argnames=("tb",))
def _dqn_pallas(x_pad, w1, b1, w2, b2, w3p, b3p, *, tb):
    """Jitted: pallas_call over the batch grid + column slice, one dispatch."""
    b_pad = x_pad.shape[0]
    grid = (b_pad // tb,)

    resident = lambda shape: pl.BlockSpec(shape, lambda i: (0, 0))  # VMEM-resident

    out = pl.pallas_call(
        dqn_kernel,
        out_shape=jax.ShapeDtypeStruct((b_pad, PAD_OUT), jnp.float32),
        grid=grid,
        in_specs=[
            pl.BlockSpec((tb, INPUT_DIM), lambda i: (i, 0)),  # streamed x tile
            resident((INPUT_DIM, HIDDEN1)),
            resident((1, HIDDEN1)),
            resident((HIDDEN1, HIDDEN2)),
            resident((1, HIDDEN2)),
            resident((HIDDEN2, PAD_OUT)),
            resident((1, PAD_OUT)),
        ],
        out_specs=pl.BlockSpec((tb, PAD_OUT), lambda i: (i, 0)),
        compiler_params=pltpu.CompilerParams(
            dimension_semantics=("parallel",),  # v7x: shard batch grid over 2 TCs
        ),
    )(x_pad, w1, b1, w2, b2, w3p, b3p)

    return out[:, :OUTPUT_DIM]


def dqn_forward(x, prepped_params):
    """Forward pass of DQN. x: (B, 14) or (14,) float32. Returns (B, 4) float32."""
    if x.ndim == 1:
        x = x[None, :]  # mirrors the PyTorch unsqueeze(0)
    b = x.shape[0]
    b_pad = _bucket_batch(b)
    tb = _choose_tile(b_pad)
    if b_pad != b:
        x = jnp.pad(x, ((0, b_pad - b), (0, 0)))
    out = _dqn_pallas(x, *prepped_params, tb=tb)
    if b_pad != b:
        out = out[:b]
    return out


def dqn_reference(x, params):
    """Pure-JAX f32 reference (matches the PyTorch module's math)."""
    if x.ndim == 1:
        x = x[None, :]
    w1, b1, w2, b2, w3, b3 = params
    hi = jax.lax.Precision.HIGHEST
    h1 = jnp.maximum(jnp.dot(x, w1, precision=hi) + b1, 0.0)
    h2 = jnp.maximum(jnp.dot(h1, w2, precision=hi) + b2, 0.0)
    return jnp.dot(h2, w3, precision=hi) + b3


if __name__ == "__main__":
    key = jax.random.PRNGKey(0)
    kp, kx = jax.random.split(key)
    params = init_params(kp)
    prepped = prepare_params(params)

    # Small batch (single grid step; batch bucketed/padded to 16).
    batch = 8
    x = jax.random.normal(kx, (batch, INPUT_DIM), jnp.float32)

    out = jax.block_until_ready(dqn_forward(x, prepped))
    ref32 = dqn_reference(x, params)
    assert out.shape == (batch, OUTPUT_DIM), out.shape
    assert jnp.allclose(out, ref32, atol=5e-3, rtol=5e-3), "mismatch vs f32 reference"

    # Larger, non-power-of-two batch: bucketed to 256, tile 128 -> 2 grid steps;
    # exercises tail zero-padding, pipelined x/out tiles, VMEM-resident weights,
    # and the v7x 2-step parallel grid.
    xb_big = jax.random.normal(jax.random.PRNGKey(1), (200, INPUT_DIM), jnp.float32)
    out_big = jax.block_until_ready(dqn_forward(xb_big, prepped))
    assert out_big.shape == (200, OUTPUT_DIM), out_big.shape
    assert jnp.allclose(out_big, dqn_reference(xb_big, params),
                        atol=5e-3, rtol=5e-3), "mismatch on gridded batch"

    # 1-D input path (unsqueeze semantics).
    out1 = jax.block_until_ready(dqn_forward(x[0], prepped))
    assert out1.shape == (1, OUTPUT_DIM), out1.shape
    assert jnp.allclose(out1, ref32[0:1], atol=5e-3, rtol=5e-3), "mismatch on 1-D path"

    print("KERNEL_OK")
</pallas_src>

<mosaic_0001>
module attributes {stable_mosaic.version = 11 : i64} {
  func.func @dqn_kernel(%arg0: i32, %arg1: memref<16x14xf32, #tpu.memory_space<vmem>>, %arg2: memref<14x128xf32, #tpu.memory_space<vmem>>, %arg3: memref<1x128xf32, #tpu.memory_space<vmem>>, %arg4: memref<128x64xf32, #tpu.memory_space<vmem>>, %arg5: memref<1x64xf32, #tpu.memory_space<vmem>>, %arg6: memref<64x8xf32, #tpu.memory_space<vmem>>, %arg7: memref<1x8xf32, #tpu.memory_space<vmem>>, %arg8: memref<16x8xf32, #tpu.memory_space<vmem>>) attributes {dimension_semantics = [#tpu.dimension_semantics<parallel>], iteration_bounds = array<i64: 1>, scalar_prefetch = 0 : i64, scratch_operands = 0 : i64, tpu.core_type = #tpu.core_type<tc>, window_params = [{transform_indices = @transform_0, window_bounds = array<i64: 16, 14>}, {pipeline_mode = #tpu.pipeline_mode<synchronous>, transform_indices = @transform_1, window_bounds = array<i64: 14, 128>}, {pipeline_mode = #tpu.pipeline_mode<synchronous>, transform_indices = @transform_2, window_bounds = array<i64: 1, 128>}, {pipeline_mode = #tpu.pipeline_mode<synchronous>, transform_indices = @transform_3, window_bounds = array<i64: 128, 64>}, {pipeline_mode = #tpu.pipeline_mode<synchronous>, transform_indices = @transform_4, window_bounds = array<i64: 1, 64>}, {pipeline_mode = #tpu.pipeline_mode<synchronous>, transform_indices = @transform_5, window_bounds = array<i64: 64, 8>}, {pipeline_mode = #tpu.pipeline_mode<synchronous>, transform_indices = @transform_6, window_bounds = array<i64: 1, 8>}, {transform_indices = @transform_7, window_bounds = array<i64: 16, 8>}]} {
    %c0 = arith.constant 0 : index
    %c0_0 = arith.constant 0 : index
    %0 = vector.load %arg1[%c0, %c0_0] : memref<16x14xf32, #tpu.memory_space<vmem>>, vector<16x14xf32>
    %c0_1 = arith.constant 0 : index
    %c0_2 = arith.constant 0 : index
    %1 = vector.load %arg2[%c0_1, %c0_2] : memref<14x128xf32, #tpu.memory_space<vmem>>, vector<14x128xf32>
    %cst = arith.constant dense<0.000000e+00> : vector<16x128xf32>
    %2 = tpu.matmul %0, %1, %cst {dimension_numbers = #tpu.dot_dimension_numbers<[1], [0], [0], [1], [0, 0, 1, 1], [], []>} : vector<16x14xf32>, vector<14x128xf32>, vector<16x128xf32> -> vector<16x128xf32>
    %c0_3 = arith.constant 0 : index
    %c0_4 = arith.constant 0 : index
    %3 = vector.load %arg3[%c0_3, %c0_4] : memref<1x128xf32, #tpu.memory_space<vmem>>, vector<1x128xf32>
    %4 = vector.broadcast %3 : vector<1x128xf32> to vector<16x128xf32>
    %5 = arith.addf %2, %4 : vector<16x128xf32>
    %cst_5 = arith.constant 0.000000e+00 : f32
    %6 = vector.broadcast %cst_5 : f32 to vector<16x128xf32>
    %7 = arith.maximumf %5, %6 : vector<16x128xf32>
    %c0_6 = arith.constant 0 : index
    %c0_7 = arith.constant 0 : index
    %8 = vector.load %arg4[%c0_6, %c0_7] : memref<128x64xf32, #tpu.memory_space<vmem>>, vector<128x64xf32>
    %cst_8 = arith.constant dense<0.000000e+00> : vector<16x64xf32>
    %9 = tpu.matmul %7, %8, %cst_8 {dimension_numbers = #tpu.dot_dimension_numbers<[1], [0], [0], [1], [0, 0, 1, 1], [], []>} : vector<16x128xf32>, vector<128x64xf32>, vector<16x64xf32> -> vector<16x64xf32>
    %c0_9 = arith.constant 0 : index
    %c0_10 = arith.constant 0 : index
    %10 = vector.load %arg5[%c0_9, %c0_10] : memref<1x64xf32, #tpu.memory_space<vmem>>, vector<1x64xf32>
    %11 = vector.broadcast %10 : vector<1x64xf32> to vector<16x64xf32>
    %12 = arith.addf %9, %11 : vector<16x64xf32>
    %cst_11 = arith.constant 0.000000e+00 : f32
    %13 = vector.broadcast %cst_11 : f32 to vector<16x64xf32>
    %14 = arith.maximumf %12, %13 : vector<16x64xf32>
    %c0_12 = arith.constant 0 : index
    %c0_13 = arith.constant 0 : index
    %15 = vector.load %arg6[%c0_12, %c0_13] : memref<64x8xf32, #tpu.memory_space<vmem>>, vector<64x8xf32>
    %cst_14 = arith.constant dense<0.000000e+00> : vector<16x8xf32>
    %16 = tpu.matmul %14, %15, %cst_14 {dimension_numbers = #tpu.dot_dimension_numbers<[1], [0], [0], [1], [0, 0, 1, 1], [], []>} : vector<16x64xf32>, vector<64x8xf32>, vector<16x8xf32> -> vector<16x8xf32>
    %c0_15 = arith.constant 0 : index
    %c0_16 = arith.constant 0 : index
    %17 = vector.load %arg7[%c0_15, %c0_16] : memref<1x8xf32, #tpu.memory_space<vmem>>, vector<1x8xf32>
    %18 = vector.broadcast %17 : vector<1x8xf32> to vector<16x8xf32>
    %19 = arith.addf %16, %18 : vector<16x8xf32>
    %c0_17 = arith.constant 0 : index
    %c0_18 = arith.constant 0 : index
    %20 = vector.load %arg8[%c0_17, %c0_18] : memref<16x8xf32, #tpu.memory_space<vmem>>, vector<16x8xf32>
    tpu.vector_store %arg8[%c0_17, %c0_18], %19 {strides = array<i32>} : memref<16x8xf32, #tpu.memory_space<vmem>>, vector<16x8xf32>,
    return
  }
  func.func @transform_0(%arg0: i32) -> (i32, i32) {
    %c0_i32 = arith.constant 0 : i32
    %c0_i32_0 = arith.constant 0 : i32
    return %arg0, %c0_i32 : i32, i32
  }
  func.func @transform_1(%arg0: i32) -> (i32, i32) {
    %c0_i32 = arith.constant 0 : i32
    %c0_i32_0 = arith.constant 0 : i32
    %c0_i32_1 = arith.constant 0 : i32
    return %c0_i32, %c0_i32_0 : i32, i32
  }
  func.func @transform_2(%arg0: i32) -> (i32, i32) {
    %c0_i32 = arith.constant 0 : i32
    %c0_i32_0 = arith.constant 0 : i32
    %c0_i32_1 = arith.constant 0 : i32
    return %c0_i32, %c0_i32_0 : i32, i32
  }
  func.func @transform_3(%arg0: i32) -> (i32, i32) {
    %c0_i32 = arith.constant 0 : i32
    %c0_i32_0 = arith.constant 0 : i32
    %c0_i32_1 = arith.constant 0 : i32
    return %c0_i32, %c0_i32_0 : i32, i32
  }
  func.func @transform_4(%arg0: i32) -> (i32, i32) {
    %c0_i32 = arith.constant 0 : i32
    %c0_i32_0 = arith.constant 0 : i32
    %c0_i32_1 = arith.constant 0 : i32
    return %c0_i32, %c0_i32_0 : i32, i32
  }
  func.func @transform_5(%arg0: i32) -> (i32, i32) {
    %c0_i32 = arith.constant 0 : i32
    %c0_i32_0 = arith.constant 0 : i32
    %c0_i32_1 = arith.constant 0 : i32
    return %c0_i32, %c0_i32_0 : i32, i32
  }
  func.func @transform_6(%arg0: i32) -> (i32, i32) {
    %c0_i32 = arith.constant 0 : i32
    %c0_i32_0 = arith.constant 0 : i32
    %c0_i32_1 = arith.constant 0 : i32
    return %c0_i32, %c0_i32_0 : i32, i32
  }
  func.func @transform_7(%arg0: i32) -> (i32, i32) {
    %c0_i32 = arith.constant 0 : i32
    %c0_i32_0 = arith.constant 0 : i32
    return %arg0, %c0_i32 : i32, i32
  }
}

</mosaic_0001>

<bundles_post_ra>
// kernel: _dqn_pallas.1
= control target key start
LH: loop header
LB: loop body
LE: loop exit
PB: predicated region body
PF: predicated region fallthrough
CT: control target
= control target key end

     0   :  { %vm44_vm0 = vcmask 1045504   ;;  %vm37_vm1 = vcmask 113664   ;;  %vm485_vm2 = vmmov 1   ;;  %vm240_vm4 = vcmask 523264   ;;  %s627_s1 = inlined_call_operand.vmem [shape: f32[14,128], index: 1, kind: input, shape index: {}]   ;;  %s628_s0 = inlined_call_operand.vmem [shape: f32[16,14], index: 0, kind: input, shape index: {}]   ;;  %s629_s3 = inlined_call_operand.vmem [shape: f32[128,64], index: 3, kind: input, shape index: {}]   ;;  %s630_s5 = inlined_call_operand.vmem [shape: f32[64,8], index: 5, kind: input, shape index: {}]   ;;  %s631_s2 = inlined_call_operand.vmem [shape: f32[1,128], index: 2, kind: input, shape index: {}]   ;;  %s632_s4 = inlined_call_operand.vmem [shape: f32[1,64], index: 4, kind: input, shape index: {}]   ;;  %s633_s6 = inlined_call_operand.vmem [shape: f32[1,8], index: 6, kind: input, shape index: {}]   ;;  %s634_s7 = inlined_call_operand.vmem [shape: f32[16,8], index: 7, kind: output, shape index: {}]  }
   0x1   :  { %v28_v0 = vld [vmem:[%s627_s1] sm:$0xff]  ;;  %v29_v1 = vld [vmem:[%s627_s1 + $0x8] sm:$0x3f]  ;;  %vm431_vm3 = vmpackc.low %vm44_vm0, %vm485_vm2  ;;  %vm322_vm5 = vcmask 64512  }
   0x2   :  { %v430_v2 = vpack.c.bf16 %v29_v1, %v28_v0  ;;  %v26_v3 = vld [vmem:[%s628_s0] sm:$0xff]  ;;  %v126_v5 = vld [vmem:[%s629_s3 + $0x8] sm:$0xff]  ;;  %v127_v6 = vld [vmem:[%s629_s3 + $0x10] sm:$0xff] }
   0x3   :  { %v125_v4 = vld [vmem:[%s629_s3] sm:$0xff]  ;;  %373 = vmatprep.mubr.msk.f32.mxu0 %vm37_vm1, %v26_v3  ;;  %v128_v7 = vld [vmem:[%s629_s3 + $0x18] sm:$0xff]  ;;  %v27_v10 = vld [vmem:[%s628_s0 + $0x8] sm:$0xff] }
   0x4   :  { %432 = vmatprep.subr.msk.bf16.mxu0 %vm431_vm3, %v430_v2  ;;  %v436_v8 = vpack.c.bf16 %v126_v5, %v125_v4  ;;  %v440_v9 = vpack.c.bf16 %v128_v7, %v127_v6  ;;  %v129_v11 = vld [vmem:[%s629_s3 + $0x20] sm:$0xff]  ;;  %v130_v12 = vld [vmem:[%s629_s3 + $0x28] sm:$0xff]  ;;  %v131_v14 = vld [vmem:[%s629_s3 + $0x30] sm:$0xff] }
   0x5   :  { %435 = vmatpush3.bf16.msk.msra.mxu0 %vm431_vm3, %v430_v2  ;;  %v444_v13 = vpack.c.bf16 %v130_v12, %v129_v11  ;;  %v132_v15 = vld [vmem:[%s629_s3 + $0x38] sm:$0xff]  ;;  %v133_v17 = vld [vmem:[%s629_s3 + $0x40] sm:$0xff]  ;;  %v134_v18 = vld [vmem:[%s629_s3 + $0x48] sm:$0xff] }
   0x6   :  { %437 = vmatprep.subr.bf16.mxu1 %v436_v8  ;;  %v448_v16 = vpack.c.bf16 %v132_v15, %v131_v14  ;;  %v452_v19 = vpack.c.bf16 %v134_v18, %v133_v17  ;;  %v135_v20 = vld [vmem:[%s629_s3 + $0x50] sm:$0xff]  ;;  %v136_v21 = vld [vmem:[%s629_s3 + $0x58] sm:$0xff]  ;;  %v137_v23 = vld [vmem:[%s629_s3 + $0x60] sm:$0xff] }
   0x7   :  { %439 = vmatpush3.bf16.msra.mxu1 %v436_v8  ;;  %v456_v22 = vpack.c.bf16 %v136_v21, %v135_v20  ;;  %v138_v24 = vld [vmem:[%s629_s3 + $0x68] sm:$0xff]  ;;  %v139_v26 = vld [vmem:[%s629_s3 + $0x70] sm:$0xff]  ;;  %v140_v27 = vld [vmem:[%s629_s3 + $0x78] sm:$0xff] }
   0x8   :  { %374 = vmatmul.mubr.msk.f32.vlgmr.msra.gmra.mrb[0].mxu0 %vm37_vm1, %v27_v10  ;;  %441 = vmatprep.subr.bf16.mxu1 %v440_v9  ;;  %v460_v25 = vpack.c.bf16 %v138_v24, %v137_v23  ;;  %v464_v28 = vpack.c.bf16 %v140_v27, %v139_v26  ;;  %v225_v29 = vld [vmem:[%s630_s5] sm:$0xff]  ;;  %v226_v30 = vld [vmem:[%s630_s5 + $0x8] sm:$0xff]  ;;  %v227_v31 = vld [vmem:[%s630_s5 + $0x10] sm:$0xff] }
   0x9   :  { %v468_v32 = vpack.c.bf16 %v226_v30, %v225_v29  ;;  %v228_v33 = vld [vmem:[%s630_s5 + $0x18] sm:$0xff]  ;;  %v229_v35 = vld [vmem:[%s630_s5 + $0x20] sm:$0xff]  ;;  %v230_v36 = vld [vmem:[%s630_s5 + $0x28] sm:$0xff] }
   0xa   :  { %v472_v34 = vpack.c.bf16 %v228_v33, %v227_v31  ;;  %v476_v37 = vpack.c.bf16 %v230_v36, %v229_v35  ;;  %v329_v38 = vld [vmem:[%s631_s2] ss:$0 sm:$0xff]  ;;  %v231_v45 = vld [vmem:[%s630_s5 + $0x30] sm:$0xff]  ;;  %v232_v46 = vld [vmem:[%s630_s5 + $0x38] sm:$0xff] }
   0xb   :  { %443 = vmatpush3.bf16.msra.mxu1 %v440_v9  ;;  %469 = vmatprep.subr.bf16.mxu0 %v468_v32  ;;  %v480_v47 = vpack.c.bf16 %v232_v46, %v231_v45  ;;  %v333_v48 = vld [vmem:[%s632_s4] ss:$0 sm:$0xff] }
   0xc   :  { %445 = vmatprep.subr.bf16.mxu1 %v444_v13  ;;  %471 = vmatpush3.bf16.msra.mxu0 %v468_v32  ;;  %v334_v55 = vld [vmem:[%s633_s6] ss:$0 sm:$0xff] }
   0xd   :  { %473 = vmatprep.subr.bf16.mxu0 %v472_v34 }
   0xf   :  { %447 = vmatpush3.bf16.msra.mxu1 %v444_v13 }
  0x10   :  { %449 = vmatprep.subr.bf16.mxu1 %v448_v16  ;;  %475 = vmatpush3.bf16.msra.mxu0 %v472_v34 }
  0x11   :  { %477 = vmatprep.subr.bf16.mxu0 %v476_v37 }
  0x13   :  { %451 = vmatpush3.bf16.msra.mxu1 %v448_v16 }
  0x14   :  { %453 = vmatprep.subr.bf16.mxu1 %v452_v19  ;;  %479 = vmatpush3.bf16.msra.mxu0 %v476_v37 }
  0x15   :  { %481 = vmatprep.subr.bf16.mxu0 %v480_v47 }
  0x17   :  { %455 = vmatpush3.bf16.msra.mxu1 %v452_v19 }
  0x18   :  { %457 = vmatprep.subr.bf16.mxu1 %v456_v22  ;;  %483 = vmatpush3.bf16.msra.mxu0 %v480_v47 }
  0x1b   :  { %459 = vmatpush3.bf16.msra.mxu1 %v456_v22 }
  0x1c   :  { %461 = vmatprep.subr.bf16.mxu1 %v460_v25 }
  0x1f   :  { %463 = vmatpush3.bf16.msra.mxu1 %v460_v25 }
  0x20   :  { %465 = vmatprep.subr.bf16.mxu1 %v464_v28 }
  0x23   :  { %467 = vmatpush3.bf16.msra.mxu1 %v464_v28 }
  0xdb   :  { %v375_v39 = vpop.f32.mrb[0].mxu0 }
  0xdc   :  { %v120_v40 = vadd.f32 %v375_v39, %v329_v38  ;;  %v114_v41 = vpop.f32.mrb[1].mxu0 }
  0xdd   :  { %v115_v42 = vadd.f32 %v329_v38, %v114_v41 }
  0xde   :  { %v124_v44 = vmax.f32 %v120_v40, 0.0 }
  0xdf   :  { %v123_v43 = vmax.f32 %v115_v42, 0.0 }
  0xe1   :  { %408 = vmatprep.mubr.f32.mxu1 %v123_v43 }
  0xe2   :  { %409 = vmatmul.mubr.f32.vlgmr.msra.gmra.mrb[0].mxu1 %v124_v44 }
 0x1b5   :  { %v410_v49 = vpop.f32.mrb[0].mxu1 }
 0x1b6   :  { %v220_v50 = vadd.f32 %v410_v49, %v333_v48  ;;  %v214_v51 = vpop.f32.mrb[1].mxu1 }
 0x1b7   :  { %v215_v52 = vadd.f32 %v333_v48, %v214_v51 }
 0x1b8   :  { %v224_v54 = vmax.f32 %v220_v50, 0.0 }
 0x1b9   :  { %v223_v53 = vmax.f32 %v215_v52, 0.0 }
 0x1bb   :  { %427 = vmatprep.mubr.msk.f32.mxu0 %vm240_vm4, %v223_v53 }
 0x1bc   :  { %428 = vmatmul.mubr.msk.f32.vlgmr.msra.gmra.mrb[2].mxu0 %vm240_vm4, %v224_v54 }
 0x28f   :  { %v429_v56 = vpop.f32.mrb[2].mxu0 }
 0x290   :  { %v319_v57 = vadd.f32 %v429_v56, %v334_v55  ;;  %v313_v58 = vpop.f32.mrb[3].mxu0 }
 0x291   :  { %v314_v59 = vadd.f32 %v334_v55, %v313_v58 }
 0x292   :  { %324 = vst.msk [vmem:[%s634_s7 + $0x8] sm:$0xff] %vm322_vm5, %v319_v57 }
 0x293   :  { %323 = vst.msk [vmem:[%s634_s7] sm:$0xff] %vm322_vm5, %v314_v59 }

</bundles_post_ra>
